<compile_context>
chip_gen: v5e
topology: v5e:2x2
jax: 0.10.0
libtpu: 0.0.40
codegen_flags: <defaults>
</compile_context>

<pallas_src>
import functools

import jax
import jax.numpy as jnp
from jax import lax
from jax.experimental import pallas as pl
from jax.experimental.pallas import tpu as pltpu

_LANE = 128
_SUBLANE = 8
_HAS_BUFFERED = hasattr(pl, "Buffered")


def _round_up(x, m):
    return (x + m - 1) // m * m


def _chip_traits():
    """Generation-aware knobs: #TensorCores and bf16 VPU/EUP availability."""
    try:
        kind = jax.devices()[0].device_kind.lower()
    except Exception:
        kind = ""
    if "v7" in kind:
        return {"num_cores": 2, "bf16_vpu": True}
    if "v6" in kind:
        return {"num_cores": 1, "bf16_vpu": True}
    if "v5" in kind:
        return {"num_cores": 1, "bf16_vpu": False}
    # Unknown generation: conservative numerics, single-core assumption.
    return {"num_cores": 1, "bf16_vpu": False}


def _vmem_capacity_bytes():
    try:
        return int(pltpu.get_tpu_info().vmem_capacity_bytes)
    except Exception:
        return 64 << 20  # v7x floor; conservative for older generations.


def resblock_kernel(x_ref, w_ref, b_ref, o_ref, *, depth, matmul_dtype,
                    act_dtype):
    # x_ref: (tb, Wp) f32   w_ref: (depth, Wp, Wp) matmul_dtype
    # b_ref: (depth, Wp) act_dtype   o_ref: (tb, Wp) f32
    def layer(d, h):
        acc = jnp.dot(
            h.astype(matmul_dtype),          # bf16 into the MXU
            w_ref[d],                        # (Wp, Wp) bf16
            preferred_element_type=jnp.float32,   # f32 accumulation
        )
        bias = b_ref[pl.ds(d, 1), :]         # (1, Wp), already act_dtype
        # bf16 bias-add + tanh on v6e/v7x (EUP is the saturating unit for the
        # serial chain); f32 on v5e.
        return jnp.tanh(acc.astype(act_dtype) + bias)

    h = x_ref[...].astype(act_dtype)
    if depth <= 4:
        # Short fixed trip-count: static unroll keeps scheduler visibility.
        for d in range(depth):
            h = layer(d, h)
    else:
        # Deep blocks: bound live ranges with a real loop.
        h = lax.fori_loop(0, depth, layer, h)

    # Residual: re-read x from VMEM instead of keeping `identity` live across
    # the whole depth chain.
    o_ref[...] = (h.astype(jnp.float32)
                  + x_ref[...].astype(jnp.float32)).astype(o_ref.dtype)


def resblock_forward(x, w, b, *, tile_batch=None, matmul_dtype=jnp.bfloat16,
                     act_dtype=None):
    """x: (B, W) f32; w: (depth, W, W) [in, out]; b: (depth, W) or (depth,1,W)."""
    B, W = x.shape
    depth = w.shape[0]
    traits = _chip_traits()
    if act_dtype is None:
        act_dtype = jnp.bfloat16 if traits["bf16_vpu"] else jnp.float32

    # ---- lane-pad the feature dim to a multiple of 128 (tanh(0)=0 keeps the
    #      padded lanes exactly zero, so results are unchanged) --------------
    Wp = _round_up(W, _LANE)
    b = jnp.asarray(b).reshape(depth, W)
    if Wp != W:
        pad = Wp - W
        x = jnp.pad(x, ((0, 0), (0, pad)))
        w = jnp.pad(w, ((0, 0), (0, pad), (0, pad)))
        b = jnp.pad(b, ((0, 0), (0, pad)))

    # Cast once in the wrapper: bf16 weights halve HBM traffic + VMEM; bias in
    # the activation dtype so the per-layer add needs no cast.
    w = w.astype(matmul_dtype)
    b = b.astype(act_dtype)

    # ---- batch tile ---------------------------------------------------------
    if tile_batch is None:
        cap = 512  # single-TC chips: fewer, bigger grid steps
        if traits["num_cores"] >= 2 and B > _SUBLANE:
            # >= 2 grid steps so dimension_semantics=("parallel",) can shard
            # the grid across both v7x TensorCores.
            tile_batch = min(cap, _round_up(max(_SUBLANE, -(-B // 2)), _SUBLANE))
        else:
            tile_batch = min(cap, _round_up(B, _SUBLANE))
    tile_batch = _round_up(max(_SUBLANE, tile_batch), _SUBLANE)

    # ---- VMEM budget (generation-aware, no hard 64 MiB clamp) --------------
    capacity = _vmem_capacity_bytes()
    headroom = 8 << 20
    w_copies = 1 if _HAS_BUFFERED else 2      # single-buffered if supported
    w_bytes = w.size * w.dtype.itemsize * w_copies
    b_bytes = b.size * b.dtype.itemsize * w_copies

    def io_bytes(tb):  # x + o, double-buffered, f32
        return 4 * tb * Wp * x.dtype.itemsize

    # Shrink the batch tile (never the resident weights) until it fits.
    while (tile_batch > _SUBLANE
           and w_bytes + b_bytes + io_bytes(tile_batch) + (4 << 20)
           > capacity - headroom):
        tile_batch = _round_up(max(_SUBLANE, tile_batch // 2), _SUBLANE)
    # TODO(synk): if the resident (depth, Wp, Wp) weight block itself exceeds
    #             the budget (large W on v7x), switch to a layer-outer grid
    #             with h round-tripped through HBM (1x weight DMA per layer).

    Bp = _round_up(B, tile_batch)
    xp = x if Bp == B else jnp.pad(x, ((0, Bp - B), (0, 0)))
    grid = (Bp // tile_batch,)

    vmem_limit = int(min(capacity - headroom,
                         max(32 << 20,
                             w_bytes + b_bytes + io_bytes(tile_batch)
                             + (8 << 20))))

    # ---- specs --------------------------------------------------------------
    x_spec = pl.BlockSpec((tile_batch, Wp), lambda i: (i, 0))
    o_spec = pl.BlockSpec((tile_batch, Wp), lambda i: (i, 0))
    if _HAS_BUFFERED:
        # Grid-invariant blocks: no need for double-buffering.
        w_spec = pl.BlockSpec((depth, Wp, Wp), lambda i: (0, 0, 0),
                              pipeline_mode=pl.Buffered(1))
        b_spec = pl.BlockSpec((depth, Wp), lambda i: (0, 0),
                              pipeline_mode=pl.Buffered(1))
    else:
        w_spec = pl.BlockSpec((depth, Wp, Wp), lambda i: (0, 0, 0))
        b_spec = pl.BlockSpec((depth, Wp), lambda i: (0, 0))

    kernel = functools.partial(resblock_kernel, depth=depth,
                               matmul_dtype=matmul_dtype, act_dtype=act_dtype)

    cost = pl.CostEstimate(
        flops=2 * depth * Bp * Wp * Wp,
        transcendentals=depth * Bp * Wp,
        bytes_accessed=int(w.size * w.dtype.itemsize
                           + b.size * b.dtype.itemsize
                           + 2 * Bp * Wp * x.dtype.itemsize),
    )

    out = pl.pallas_call(
        kernel,
        out_shape=jax.ShapeDtypeStruct((Bp, Wp), x.dtype),
        grid_spec=pltpu.PrefetchScalarGridSpec(
            num_scalar_prefetch=0,
            grid=grid,
            in_specs=[x_spec, w_spec, b_spec],
            out_specs=o_spec,
        ),
        compiler_params=pltpu.CompilerParams(
            dimension_semantics=("parallel",),
            vmem_limit_bytes=vmem_limit,
        ),
        cost_estimate=cost,
    )(xp, w, b)

    return out[:B, :W]


def reference_forward(x, w, b, matmul_dtype=jnp.float32,
                      act_dtype=jnp.float32):
    """Pure-JAX reference matching the PyTorch module semantics.

    matmul_dtype / act_dtype mirror the kernel's MXU-input and bias/tanh
    dtypes (accumulation is always f32).
    """
    identity = x.astype(jnp.float32)
    h = x.astype(act_dtype)
    for d in range(w.shape[0]):
        acc = jnp.dot(h.astype(matmul_dtype), w[d].astype(matmul_dtype),
                      preferred_element_type=jnp.float32)
        bias = b[d].reshape(1, -1).astype(act_dtype)
        h = jnp.tanh(acc.astype(act_dtype) + bias)
    return h.astype(jnp.float32) + identity


if __name__ == "__main__":
    # Module hyperparameters (as ResBlock(depth, block_width, activation)).
    depth = 3
    block_width = 32
    batch = 16

    key = jax.random.PRNGKey(0)
    kx, kw, kb = jax.random.split(key, 3)

    # nn.Linear-style deterministic init: uniform(-1/sqrt(W), 1/sqrt(W)).
    bound = 1.0 / jnp.sqrt(jnp.float32(block_width))
    # Stored already transposed relative to PyTorch's (out, in) layout.
    w = jax.random.uniform(
        kw, (depth, block_width, block_width), jnp.float32, -bound, bound
    )
    b = jax.random.uniform(kb, (depth, block_width), jnp.float32, -bound, bound)
    x = jax.random.normal(kx, (batch, block_width), jnp.float32)

    out = jax.block_until_ready(resblock_forward(x, w, b))
    assert out.shape == (batch, block_width)

    traits = _chip_traits()
    act_dtype = jnp.bfloat16 if traits["bf16_vpu"] else jnp.float32

    # Tight check against a reference using the same matmul/activation dtypes
    # as the kernel.
    ref_same = reference_forward(x, w, b, matmul_dtype=jnp.bfloat16,
                                 act_dtype=act_dtype)
    tight = 2e-2 if act_dtype == jnp.bfloat16 else 1e-4
    assert jnp.allclose(out, ref_same, atol=tight, rtol=tight), (
        "mismatch vs matching-dtype reference"
    )

    # Loose check against the exact f32 PyTorch-equivalent math (bf16 MXU
    # inputs / bf16 tanh introduce small bounded rounding error).
    ref_f32 = reference_forward(x, w, b)
    assert jnp.allclose(out, ref_f32, atol=5e-2, rtol=5e-2), (
        "mismatch vs f32 reference"
    )

    print("KERNEL_OK")
</pallas_src>

<mosaic_0001>
module attributes {stable_mosaic.version = 11 : i64} {
  func.func @resblock_kernel(%arg0: i32, %arg1: memref<16x128xf32, #tpu.memory_space<vmem>>, %arg2: memref<3x128x128xbf16, #tpu.memory_space<vmem>>, %arg3: memref<3x128xf32, #tpu.memory_space<vmem>>, %arg4: memref<16x128xf32, #tpu.memory_space<vmem>>) attributes {dimension_semantics = [#tpu.dimension_semantics<parallel>], iteration_bounds = array<i64: 1>, scalar_prefetch = 0 : i64, scratch_operands = 0 : i64, tpu.core_type = #tpu.core_type<tc>, window_params = [{transform_indices = @transform_0, window_bounds = array<i64: 16, 128>}, {pipeline_mode = #tpu.pipeline_mode<synchronous>, transform_indices = @transform_1, window_bounds = array<i64: 3, 128, 128>}, {pipeline_mode = #tpu.pipeline_mode<synchronous>, transform_indices = @transform_2, window_bounds = array<i64: 3, 128>}, {transform_indices = @transform_3, window_bounds = array<i64: 16, 128>}]} {
    %c0 = arith.constant 0 : index
    %c0_0 = arith.constant 0 : index
    %0 = vector.load %arg1[%c0, %c0_0] : memref<16x128xf32, #tpu.memory_space<vmem>>, vector<16x128xf32>
    %1 = arith.truncf %0 : vector<16x128xf32> to vector<16x128xbf16>
    %c0_1 = arith.constant 0 : index
    %c0_2 = arith.constant 0 : index
    %c0_3 = arith.constant 0 : index
    %2 = vector.load %arg2[%c0_1, %c0_2, %c0_3] : memref<3x128x128xbf16, #tpu.memory_space<vmem>>, vector<1x128x128xbf16>
    %3 = vector.shape_cast %2 : vector<1x128x128xbf16> to vector<128x128xbf16>
    %cst = arith.constant dense<0.000000e+00> : vector<16x128xf32>
    %4 = tpu.matmul %1, %3, %cst {dimension_numbers = #tpu.dot_dimension_numbers<[1], [0], [0], [1], [0, 0, 1, 1], [], []>} : vector<16x128xbf16>, vector<128x128xbf16>, vector<16x128xf32> -> vector<16x128xf32>
    %c0_4 = arith.constant 0 : index
    %c0_5 = arith.constant 0 : index
    %5 = vector.load %arg3[%c0_4, %c0_5] : memref<3x128xf32, #tpu.memory_space<vmem>>, vector<1x128xf32>
    %6 = vector.broadcast %5 : vector<1x128xf32> to vector<16x128xf32>
    %7 = arith.addf %4, %6 : vector<16x128xf32>
    %8 = math.tanh %7 : vector<16x128xf32>
    %9 = arith.truncf %8 : vector<16x128xf32> to vector<16x128xbf16>
    %c1 = arith.constant 1 : index
    %c0_6 = arith.constant 0 : index
    %c0_7 = arith.constant 0 : index
    %10 = vector.load %arg2[%c1, %c0_6, %c0_7] : memref<3x128x128xbf16, #tpu.memory_space<vmem>>, vector<1x128x128xbf16>
    %11 = vector.shape_cast %10 : vector<1x128x128xbf16> to vector<128x128xbf16>
    %cst_8 = arith.constant dense<0.000000e+00> : vector<16x128xf32>
    %12 = tpu.matmul %9, %11, %cst_8 {dimension_numbers = #tpu.dot_dimension_numbers<[1], [0], [0], [1], [0, 0, 1, 1], [], []>} : vector<16x128xbf16>, vector<128x128xbf16>, vector<16x128xf32> -> vector<16x128xf32>
    %c1_9 = arith.constant 1 : index
    %c0_10 = arith.constant 0 : index
    %13 = vector.load %arg3[%c1_9, %c0_10] : memref<3x128xf32, #tpu.memory_space<vmem>>, vector<1x128xf32>
    %14 = vector.broadcast %13 : vector<1x128xf32> to vector<16x128xf32>
    %15 = arith.addf %12, %14 : vector<16x128xf32>
    %16 = math.tanh %15 : vector<16x128xf32>
    %17 = arith.truncf %16 : vector<16x128xf32> to vector<16x128xbf16>
    %c2 = arith.constant 2 : index
    %c0_11 = arith.constant 0 : index
    %c0_12 = arith.constant 0 : index
    %18 = vector.load %arg2[%c2, %c0_11, %c0_12] : memref<3x128x128xbf16, #tpu.memory_space<vmem>>, vector<1x128x128xbf16>
    %19 = vector.shape_cast %18 : vector<1x128x128xbf16> to vector<128x128xbf16>
    %cst_13 = arith.constant dense<0.000000e+00> : vector<16x128xf32>
    %20 = tpu.matmul %17, %19, %cst_13 {dimension_numbers = #tpu.dot_dimension_numbers<[1], [0], [0], [1], [0, 0, 1, 1], [], []>} : vector<16x128xbf16>, vector<128x128xbf16>, vector<16x128xf32> -> vector<16x128xf32>
    %c2_14 = arith.constant 2 : index
    %c0_15 = arith.constant 0 : index
    %21 = vector.load %arg3[%c2_14, %c0_15] : memref<3x128xf32, #tpu.memory_space<vmem>>, vector<1x128xf32>
    %22 = vector.broadcast %21 : vector<1x128xf32> to vector<16x128xf32>
    %23 = arith.addf %20, %22 : vector<16x128xf32>
    %24 = math.tanh %23 : vector<16x128xf32>
    %c0_16 = arith.constant 0 : index
    %c0_17 = arith.constant 0 : index
    %25 = vector.load %arg1[%c0_16, %c0_17] : memref<16x128xf32, #tpu.memory_space<vmem>>, vector<16x128xf32>
    %26 = arith.addf %24, %25 : vector<16x128xf32>
    %c0_18 = arith.constant 0 : index
    %c0_19 = arith.constant 0 : index
    %27 = vector.load %arg4[%c0_18, %c0_19] : memref<16x128xf32, #tpu.memory_space<vmem>>, vector<16x128xf32>
    tpu.vector_store %arg4[%c0_18, %c0_19], %26 {strides = array<i32>} : memref<16x128xf32, #tpu.memory_space<vmem>>, vector<16x128xf32>,
    return
  }
  func.func @transform_0(%arg0: i32) -> (i32, i32) {
    %c0_i32 = arith.constant 0 : i32
    %c0_i32_0 = arith.constant 0 : i32
    return %arg0, %c0_i32 : i32, i32
  }
  func.func @transform_1(%arg0: i32) -> (i32, i32, i32) {
    %c0_i32 = arith.constant 0 : i32
    %c0_i32_0 = arith.constant 0 : i32
    %c0_i32_1 = arith.constant 0 : i32
    %c0_i32_2 = arith.constant 0 : i32
    return %c0_i32, %c0_i32_0, %c0_i32_1 : i32, i32, i32
  }
  func.func @transform_2(%arg0: i32) -> (i32, i32) {
    %c0_i32 = arith.constant 0 : i32
    %c0_i32_0 = arith.constant 0 : i32
    %c0_i32_1 = arith.constant 0 : i32
    return %c0_i32, %c0_i32_0 : i32, i32
  }
  func.func @transform_3(%arg0: i32) -> (i32, i32) {
    %c0_i32 = arith.constant 0 : i32
    %c0_i32_0 = arith.constant 0 : i32
    return %arg0, %c0_i32 : i32, i32
  }
}

</mosaic_0001>

<bundles_post_ra>
// kernel: tpu_custom_call.1
= control target key start
LH: loop header
LB: loop body
LE: loop exit
PB: predicated region body
PF: predicated region fallthrough
CT: control target
= control target key end

     0   :  { %8 = vsyncpa [#allocation3], 0  ;;  %s632_s0 = inlined_call_operand.hbm [shape: f32[16,128], index: 0, kind: input, shape index: {}]   ;;  %s633_s1 = inlined_call_operand.hbm [shape: bf16[3,128,128], index: 1, kind: input, shape index: {}]   ;;  %s634_s2 = inlined_call_operand.hbm [shape: f32[3,128], index: 2, kind: input, shape index: {}]   ;;  %s635_s3 = inlined_call_operand.hbm [shape: f32[16,128], index: 3, kind: output, shape index: {}]  }
   0x1   :  { %9 = vsyncpa [#allocation6], 0  ;;  %s28_s14 = sshll.u32 %s633_s1, 4  ;;  %s29_s14 = int_to_ptr.hbm [resolvable:$true] %s28_s14 }
   0x2   :  { %10 = vsyncpa [#allocation4], 0  ;;  %s582_s15 = smov [#allocation5]   ;;  %s15_s19 = sshll.u32 %s632_s0, 4  ;;  %s16_s19 = int_to_ptr.hbm [resolvable:$true] %s15_s19 }
   0x3   :  { %s30_s16 = sshll.u32 %s582_s15, 4  ;;  %s583_s20 = smov 64   ;;  %s31_s16 = int_to_ptr.vmem [resolvable:$true] %s30_s16 }
   0x4   :  { %s584_s21 = smov 4   ;;  %s585_s22 = smov [#allocation2]  }
   0x5   :  { %36 = dma.hbm_to_vmem [thread:$0]  %s29_s14, 3072, %s31_s16, [#allocation6], %s583_s20, %s583_s20, %s584_s21  }
   0x6   :  { %s17_s23 = sshll.u32 %s585_s22, 4  ;;  %s586_s24 = smov 128   ;;  %s18_s23 = int_to_ptr.vmem [resolvable:$true] %s17_s23 }
   0x7   :  { %s587_s25 = smov 8   ;;  %s42_s27 = sshll.u32 %s634_s2, 4  ;;  %s43_s27 = int_to_ptr.hbm [resolvable:$true] %s42_s27 }
   0x8   :  { %23 = dma.hbm_to_vmem [thread:$0]  %s16_s19, 256, %s18_s23, [#allocation3], %s586_s24, %s586_s24, %s587_s25  }
   0x9   :  { %s588_s28 = smov [#allocation7]  }
   0xa   :  { %s44_s0 = sshll.u32 %s588_s28, 4  ;;  %s45_s0 = int_to_ptr.vmem [resolvable:$true] %s44_s0 }
   0xb   :  { %47 = dma.hbm_to_vmem [thread:$0]  %s43_s27, 64, %s45_s0, [#allocation6]  }
   0xc   :  { %576 = dma.done.wait [#allocation3], 256  }
   0xd   :  { %577 = vsyncadd [#allocation3], 4294967040 }
   0xe   :  { %578 = dma.done.wait [#allocation6], 3136  }
   0xf   :  { %579 = vsyncadd [#allocation6], 4294964160  ;;  %v440_v0 = vld [vmem:[#allocation5 + $0x38] sm:$0xff]  ;;  %v439_v1 = vld [vmem:[#allocation5 + $0x30] sm:$0xff]  ;;  %s589_s2 = smov [#allocation8]   ;;  %s323_s5 = sshll.u32 %s635_s3, 4  ;;  %s324_s5 = int_to_ptr.hbm [resolvable:$true] %s323_s5 }
  0x10   :  { %129 = vmatpush.bf16.msra.mxu0 %v440_v0  ;;  %v448_v2 = vld [vmem:[#allocation5 + $0x78] sm:$0xff]  ;;  %v447_v3 = vld [vmem:[#allocation5 + $0x70] sm:$0xff]  ;;  %v438_v4 = vld [vmem:[#allocation5 + $0x28] sm:$0xff]  ;;  %s321_s29 = sshll.u32 %s589_s2, 4  ;;  %s322_s29 = int_to_ptr.vmem [resolvable:$true] %s321_s29 }
  0x11   :  { %213 = vmatpush.bf16.msra.mxu1 %v448_v2  ;;  %v446_v5 = vld [vmem:[#allocation5 + $0x68] sm:$0xff]  ;;  %v437_v6 = vld [vmem:[#allocation5 + $0x20] sm:$0xff]  ;;  %v436_v7 = vld [vmem:[#allocation5 + $0x18] sm:$0xff] }
  0x12   :  { %v435_v8 = vld [vmem:[#allocation5 + $0x10] sm:$0xff]  ;;  %v434_v9 = vld [vmem:[#allocation5 + $0x8] sm:$0xff]  ;;  %v433_v10 = vld [vmem:[#allocation5] sm:$0xff] }
  0x13   :  { %v60_v11 = vld [vmem:[#allocation2] sm:$0xff]  ;;  %v622_v12 = vld [vmem:[#allocation2 + $0x8] sm:$0xff]  ;;  %v445_v14 = vld [vmem:[#allocation5 + $0x60] sm:$0xff] }
  0x14   :  { %130 = vmatpush.bf16.msra.mxu0 %v439_v1  ;;  %v62_v13 = vpack.c.bf16 %v622_v12, %v60_v11  ;;  %v444_v15 = vld [vmem:[#allocation5 + $0x58] sm:$0xff]  ;;  %v443_v16 = vld [vmem:[#allocation5 + $0x50] sm:$0xff]  ;;  %v442_v17 = vld [vmem:[#allocation5 + $0x48] sm:$0xff] }
  0x15   :  { %214 = vmatpush.bf16.msra.mxu1 %v447_v3  ;;  %v441_v18 = vld [vmem:[#allocation5 + $0x40] sm:$0xff]  ;;  %v456_v19 = vld [vmem:[#allocation5 + $0xb8] sm:$0xff]  ;;  %v455_v20 = vld [vmem:[#allocation5 + $0xb0] sm:$0xff] }
  0x16   :  { %297 = vmatpush.bf16.msra.mxu2 %v456_v19  ;;  %v454_v21 = vld [vmem:[#allocation5 + $0xa8] sm:$0xff]  ;;  %v465_v23 = vld [vmem:[#allocation7] ss:$0 sm:$0xff]  ;;  %v452_v31 = vld [vmem:[#allocation5 + $0x98] sm:$0xff] }
  0x17   :  { %v453_v30 = vld [vmem:[#allocation5 + $0xa0] sm:$0xff]  ;;  %v451_v32 = vld [vmem:[#allocation5 + $0x90] sm:$0xff]  ;;  %v450_v33 = vld [vmem:[#allocation5 + $0x88] sm:$0xff] }
  0x18   :  { %131 = vmatpush.bf16.msra.mxu0 %v438_v4  ;;  %v449_v34 = vld [vmem:[#allocation5 + $0x80] sm:$0xff] }
  0x19   :  { %215 = vmatpush.bf16.msra.mxu1 %v446_v5  ;;  %v466_v36 = vld [vmem:[#allocation7 + $0x1] ss:$0 sm:$0xff]  ;;  %v467_v43 = vld [vmem:[#allocation7 + $0x2] ss:$0 sm:$0xff] }
  0x1a   :  { %298 = vmatpush.bf16.msra.mxu2 %v455_v20 }
  0x1c   :  { %132 = vmatpush.bf16.msra.mxu0 %v437_v6 }
  0x1d   :  { %216 = vmatpush.bf16.msra.mxu1 %v445_v14 }
  0x1e   :  { %299 = vmatpush.bf16.msra.mxu2 %v454_v21 }
  0x20   :  { %133 = vmatpush.bf16.msra.mxu0 %v436_v7 }
  0x21   :  { %217 = vmatpush.bf16.msra.mxu1 %v444_v15 }
  0x22   :  { %300 = vmatpush.bf16.msra.mxu2 %v453_v30 }
  0x24   :  { %134 = vmatpush.bf16.msra.mxu0 %v435_v8 }
  0x25   :  { %218 = vmatpush.bf16.msra.mxu1 %v443_v16 }
  0x26   :  { %301 = vmatpush.bf16.msra.mxu2 %v452_v31 }
  0x28   :  { %135 = vmatpush.bf16.msra.mxu0 %v434_v9 }
  0x29   :  { %219 = vmatpush.bf16.msra.mxu1 %v442_v17 }
  0x2a   :  { %302 = vmatpush.bf16.msra.mxu2 %v451_v32 }
  0x2c   :  { %136 = vmatpush.bf16.msra.mxu0 %v433_v10 }
  0x2d   :  { %220 = vmatpush.bf16.msra.mxu1 %v441_v18 }
  0x2e   :  { %303 = vmatpush.bf16.msra.mxu2 %v450_v33 }
  0x2f   :  { %137 = vmatmul.bf16.vlgmr.msra.gmra.mxu0 %v62_v13 }
  0x32   :  { %304 = vmatpush.bf16.msra.mxu2 %v449_v34 }
  0xac   :  { %v138_v22 = vpop.f32.mrf.mxu0 }
  0xad   :  { %v139_v24 = vadd.f32 %v465_v23, %v138_v22 }
  0xaf   :  { %468 = vtanh.f32 %v139_v24 }
  0xb4   :  { %v140_v25 = vpop.f32.mrf.mxu0 }
  0xb5   :  { %v141_v26 = vadd.f32 %v465_v23, %v140_v25  ;;  %v469_v27 = vpop.eup %468 }
  0xb7   :  { %470 = vtanh.f32 %v141_v26 }
  0xbd   :  { %v471_v28 = vpop.eup %470 }
  0xbe   :  { %v145_v29 = vpack.c.bf16 %v471_v28, %v469_v27 }
  0xc0   :  { %221 = vmatmul.bf16.vlgmr.msra.gmra.mxu1 %v145_v29 }
 0x13d   :  { %v222_v35 = vpop.f32.mrf.mxu1 }
 0x13e   :  { %v223_v37 = vadd.f32 %v466_v36, %v222_v35 }
 0x140   :  { %472 = vtanh.f32 %v223_v37 }
 0x145   :  { %v224_v38 = vpop.f32.mrf.mxu1 }
 0x146   :  { %v225_v39 = vadd.f32 %v466_v36, %v224_v38  ;;  %v473_v40 = vpop.eup %472 }
 0x148   :  { %474 = vtanh.f32 %v225_v39 }
 0x14e   :  { %v475_v41 = vpop.eup %474 }
 0x14f   :  { %v229_v42 = vpack.c.bf16 %v475_v41, %v473_v40 }
 0x151   :  { %305 = vmatmul.bf16.vlgmr.msra.gmra.mxu2 %v229_v42 }
 0x1d4   :  { %v306_v44 = vpop.f32.mrf.mxu2 }
 0x1d5   :  { %v307_v45 = vadd.f32 %v467_v43, %v306_v44 }
 0x1d7   :  { %476 = vtanh.f32 %v307_v45 }
 0x1dc   :  { %v308_v46 = vpop.f32.mrf.mxu2 }
 0x1dd   :  { %v477_v47 = vpop.eup %476  ;;  %v309_v48 = vadd.f32 %v467_v43, %v308_v46 }
 0x1de   :  { %v313_v49 = vadd.f32 %v477_v47, %v60_v11 }
 0x1df   :  { %478 = vtanh.f32 %v309_v48 }
 0x1e0   :  { %315 = vst [vmem:[#allocation8] sm:$0xff] %v313_v49 }
 0x1e5   :  { %v479_v50 = vpop.eup %478 }
 0x1e6   :  { %v314_v51 = vadd.f32 %v479_v50, %v622_v12 }
 0x1e8   :  { %316 = vst [vmem:[#allocation8 + $0x8] sm:$0xff] %v314_v51 }
 0x1e9   :  { %329 = dma.vmem_to_hbm [thread:$0]  %s322_s29, 256, %s324_s5, [#allocation4], %s586_s24, %s586_s24, %s587_s25  }
 0x1ea   :  { %580 = dma.done.wait [#allocation4], 256  }
 0x1eb   :  { %581 = vsyncadd [#allocation4], 4294967040 }
 0x1ec   :  { %334 = vsyncpa [#allocation3], 1 }
 0x1ed   :  { %335 = vsyncpa [#allocation6], 1 }
 0x1ee   :  { %336 = vsyncpa [#allocation4], 1 }

</bundles_post_ra>
